<compile_context>
chip_gen: v7x
topology: tpu7x:2x2x1
jax: 0.10.0
libtpu: 0.0.40
codegen_flags: <defaults>
</compile_context>

<pallas_src>
import functools

import jax
import jax.numpy as jnp
from jax.experimental import pallas as pl
from jax.experimental.pallas import tpu as pltpu


def moe_expert_kernel(wmap_ref, act_ref, x_ref, w_ref, b_ref, cw_ref, o_ref,
                      acc_ref, *, nbk):
    del wmap_ref  # only consumed by the W index_map
    i = pl.program_id(0)          # token block
    e = pl.program_id(2)          # expert (reduction axis)
    k = pl.program_id(3)          # contraction block (reduction axis)

    @pl.when((e == 0) & (k == 0))
    def _init():
        o_ref[...] = jnp.zeros_like(o_ref)

    # Experts that own no token in this token block have combine weight == 0
    # everywhere -> their contribution is exactly zero, so skipping is
    # lossless (their weight DMA is also elided via w_index_map).
    @pl.when(act_ref[i, e] > 0)
    def _compute():
        if nbk == 1:
            # Single K step: no scratch needed; bias + combine weight applied
            # once, in f32.
            y = jnp.dot(x_ref[...], w_ref[0],
                        preferred_element_type=jnp.float32)
            o_ref[...] += cw_ref[0] * (y + b_ref[0])
        else:
            @pl.when(k == 0)
            def _zero():
                acc_ref[...] = jnp.zeros_like(acc_ref)

            # Raw partial sums across K; epilogue (bias + combine weight) only
            # at the last K step -> ~1 VPU op/elem per inner step.
            acc_ref[...] += jnp.dot(x_ref[...], w_ref[0],
                                    preferred_element_type=jnp.float32)

            @pl.when(k == nbk - 1)
            def _finalize():
                o_ref[...] += cw_ref[0] * (acc_ref[...] + b_ref[0])


@functools.partial(jax.jit, static_argnames=("block_m", "block_n", "block_k"))
def brute_force_moe_forward(inp, gate_idx, gate_score, expert_w, expert_b,
                            block_m=512, block_n=1024, block_k=1024):
    """inp: [B, D] f32. gate_idx: [B, K] int. gate_score: [B, K] f32.
    expert_w: [E, D, D] (pre-transposed Linear weights). expert_b: [E, D]."""
    B, D = inp.shape
    E = expert_w.shape[0]

    # ---- tile selection --------------------------------------------------
    tn = D if D <= 1024 else min(block_n, D)   # full-width N when it fits
    tk = D if D <= 1024 else min(block_k, D)
    tm = min(block_m, B)                       # weight-reuse lever
    # v7x megacore: keep at least two parallel (token, N) blocks when possible
    # so both TensorCores get work (no effect on 1-TC v5e/v6e).
    if (B // tm) * (D // tn) < 2 and B % 256 == 0:
        tm = min(tm, B // 2)
    assert B % tm == 0 and D % tn == 0 and D % tk == 0, (B, D, tm, tn, tk)
    nbi, nbn, nbk = B // tm, D // tn, D // tk

    # ---- routing prep (plain JAX glue) ------------------------------------
    # cw[e, b] = sum_k gate_score[b, k] * 1{gate_idx[b, k] == e}
    one_hot = jax.nn.one_hot(gate_idx, E, dtype=jnp.float32)              # [B,K,E]
    cw = jnp.einsum("bk,bke->eb", gate_score.astype(jnp.float32), one_hot)  # [E,B]
    cw3 = cw[:, :, None]                                                   # [E,B,1]
    b3 = expert_b.reshape(E, 1, D).astype(jnp.float32)                     # [E,1,D]

    # Per-(token-block, expert) activity + "last fetched expert" remap tables
    # (scalar-prefetched into SMEM).
    active_eb = (cw.reshape(E, nbi, tm) != 0.0).any(axis=-1)               # [E,nbi]
    act = active_eb.T.astype(jnp.int32)                                    # [nbi,E]
    e_ids = jnp.arange(E, dtype=jnp.int32)[:, None]
    wmap = jnp.maximum(
        jax.lax.cummax(jnp.where(active_eb, e_ids, -1), axis=0), 0
    ).T.astype(jnp.int32)                                                  # [nbi,E]

    # bf16 operands for the MXU (f32 accumulation); epilogue stays f32.
    x_bf = inp.astype(jnp.bfloat16)
    w_bf = expert_w.astype(jnp.bfloat16)

    def w_index_map(i, n, e, k, wmap_ref, act_ref):
        a = act_ref[i, e]
        # Active:   fetch (e, k, n) as usual (wmap[i, e] == e).
        # Inactive: pin to the previously fetched (expert, k) block so the
        #           weight DMA is elided; the data is never read (compute
        #           is skipped for this expert).
        e_idx = wmap_ref[i, e]
        k_idx = a * k + (1 - a) * (nbk - 1)
        return (e_idx, k_idx, n)

    # Double-buffered VMEM footprint; only raise the scoped limit when needed.
    vmem_bytes = (2 * tm * tk * 2 + 2 * tk * tn * 2        # x, W (bf16, 2-buf)
                  + 2 * tm * tn * 4                         # output tile (f32)
                  + (tm * tn * 4 if nbk > 1 else 0)         # acc scratch
                  + 2 * (tn + tm) * 4)                      # bias + combine wts
    vmem_limit = None
    if vmem_bytes > 12 * 1024 * 1024:
        vmem_limit = min(64 * 1024 * 1024, int(1.5 * vmem_bytes) + (2 << 20))

    return pl.pallas_call(
        functools.partial(moe_expert_kernel, nbk=nbk),
        out_shape=jax.ShapeDtypeStruct((B, D), jnp.float32),
        grid_spec=pltpu.PrefetchScalarGridSpec(
            num_scalar_prefetch=2,                    # wmap, act -> SMEM
            grid=(nbi, nbn, E, nbk),                  # reduction axes last
            in_specs=[
                pl.BlockSpec((tm, tk), lambda i, n, e, k, wmap, act: (i, k)),      # x
                pl.BlockSpec((1, tk, tn), w_index_map),                            # W[e]
                pl.BlockSpec((1, 1, tn), lambda i, n, e, k, wmap, act: (e, 0, n)),  # b[e]
                pl.BlockSpec((1, tm, 1), lambda i, n, e, k, wmap, act: (e, i, 0)),  # cw[e]
            ],
            out_specs=pl.BlockSpec((tm, tn), lambda i, n, e, k, wmap, act: (i, n)),
            scratch_shapes=[pltpu.VMEM((tm, tn), jnp.float32)],
        ),
        compiler_params=pltpu.CompilerParams(
            dimension_semantics=("parallel", "parallel", "arbitrary", "arbitrary"),
            vmem_limit_bytes=vmem_limit,
        ),
    )(wmap, act, x_bf, w_bf, b3, cw3)


def _reference(inp, gate_idx, gate_score, expert_w, expert_b):
    # Pure-JAX, f32 replica of BruteForceMoE.forward with Linear experts.
    y_all = jnp.einsum("bd,edf->bef", inp, expert_w) + expert_b[None]   # [B,E,D]
    sel = jnp.take_along_axis(y_all, gate_idx[..., None], axis=1)       # [B,K,D]
    return jnp.einsum("bk,bkd->bd", gate_score, sel)


if __name__ == "__main__":
    B = 256           # tokens
    d_model = 256
    num_expert = 8
    top_k = 2

    key = jax.random.PRNGKey(0)
    k1, k2, k3, k4 = jax.random.split(key, 4)
    inp = jax.random.normal(k1, (B, d_model), dtype=jnp.float32)
    expert_w = jax.random.normal(
        k2, (num_expert, d_model, d_model), dtype=jnp.float32) * 0.05
    expert_b = jax.random.normal(
        k3, (num_expert, d_model), dtype=jnp.float32) * 0.05

    # External gate (the module receives gate_idx / gate_score as inputs).
    # Leave the last two experts unrouted so the inactive-expert compute +
    # weight-DMA skip path is exercised.
    logits = jax.random.normal(k4, (B, num_expert), dtype=jnp.float32)
    logits = logits.at[:, num_expert - 2:].add(-1e9)
    gate_val, gate_idx = jax.lax.top_k(logits, top_k)
    gate_score = jax.nn.softmax(gate_val, axis=-1)

    out = brute_force_moe_forward(inp, gate_idx, gate_score, expert_w, expert_b)
    out = jax.block_until_ready(out)

    ref = _reference(inp, gate_idx, gate_score, expert_w, expert_b)
    assert out.shape == (B, d_model)
    # bf16 matmul inputs (f32 accumulation) -> relaxed tolerance vs f32 ref.
    max_err = float(jnp.max(jnp.abs(out - ref)))
    assert jnp.allclose(out, ref, atol=5e-2, rtol=5e-2), max_err
    print("KERNEL_OK")
</pallas_src>

<mosaic_0001>
module attributes {stable_mosaic.version = 11 : i64} {
  func.func @moe_expert_kernel(%arg0: i32, %arg1: i32, %arg2: i32, %arg3: i32, %arg4: memref<2x8xi32, #tpu.memory_space<smem>>, %arg5: memref<2x8xi32, #tpu.memory_space<smem>>, %arg6: memref<128x256xbf16, #tpu.memory_space<vmem>>, %arg7: memref<1x256x256xbf16, #tpu.memory_space<vmem>>, %arg8: memref<1x1x256xf32, #tpu.memory_space<vmem>>, %arg9: memref<1x128x1xf32, #tpu.memory_space<vmem>>, %arg10: memref<128x256xf32, #tpu.memory_space<vmem>>, %arg11: memref<128x256xf32, #tpu.memory_space<vmem>>) attributes {dimension_semantics = [#tpu.dimension_semantics<parallel>, #tpu.dimension_semantics<parallel>, #tpu.dimension_semantics<arbitrary>, #tpu.dimension_semantics<arbitrary>], iteration_bounds = array<i64: 2, 1, 8, 1>, scalar_prefetch = 2 : i64, scratch_operands = 1 : i64, tpu.core_type = #tpu.core_type<tc>, window_params = [{transform_indices = @transform_0, window_bounds = array<i64: 128, 256>}, {transform_indices = @transform_1, window_bounds = array<i64: 1, 256, 256>}, {transform_indices = @transform_2, window_bounds = array<i64: 1, 1, 256>}, {transform_indices = @transform_3, window_bounds = array<i64: 1, 128, 1>}, {transform_indices = @transform_4, window_bounds = array<i64: 128, 256>}]} {
    %c0_i32 = arith.constant 0 : i32
    %0 = arith.cmpi eq, %arg2, %c0_i32 : i32
    %c0_i32_0 = arith.constant 0 : i32
    %1 = arith.cmpi eq, %arg3, %c0_i32_0 : i32
    %2 = arith.andi %0, %1 : i1
    %3 = arith.extui %2 : i1 to i32
    %c0_i32_1 = arith.constant 0 : i32
    %4 = arith.cmpi ne, %3, %c0_i32_1 : i32
    scf.if %4 {
      %cst = arith.constant 0.000000e+00 : f32
      %11 = vector.broadcast %cst : f32 to vector<128x256xf32>
      %c0 = arith.constant 0 : index
      %c0_4 = arith.constant 0 : index
      %12 = vector.load %arg10[%c0, %c0_4] : memref<128x256xf32, #tpu.memory_space<vmem>>, vector<128x256xf32>
      tpu.vector_store %arg10[%c0, %c0_4], %11 {strides = array<i32>} : memref<128x256xf32, #tpu.memory_space<vmem>>, vector<128x256xf32>,
    } else {
    }
    %5 = arith.index_cast %arg0 : i32 to index
    %6 = arith.index_cast %arg2 : i32 to index
    %7 = memref.load %arg5[%5, %6] : memref<2x8xi32, #tpu.memory_space<smem>>
    %c0_i32_2 = arith.constant 0 : i32
    %8 = arith.cmpi sgt, %7, %c0_i32_2 : i32
    %9 = arith.extui %8 : i1 to i32
    %c0_i32_3 = arith.constant 0 : i32
    %10 = arith.cmpi ne, %9, %c0_i32_3 : i32
    scf.if %10 {
      %c0 = arith.constant 0 : index
      %c0_4 = arith.constant 0 : index
      %11 = vector.load %arg6[%c0, %c0_4] : memref<128x256xbf16, #tpu.memory_space<vmem>>, vector<128x256xbf16>
      %c0_5 = arith.constant 0 : index
      %c0_6 = arith.constant 0 : index
      %c0_7 = arith.constant 0 : index
      %12 = vector.load %arg7[%c0_5, %c0_6, %c0_7] : memref<1x256x256xbf16, #tpu.memory_space<vmem>>, vector<1x256x256xbf16>
      %13 = vector.shape_cast %12 : vector<1x256x256xbf16> to vector<256x256xbf16>
      %cst = arith.constant dense<0.000000e+00> : vector<128x256xf32>
      %14 = tpu.matmul %11, %13, %cst {dimension_numbers = #tpu.dot_dimension_numbers<[1], [0], [0], [1], [0, 0, 1, 1], [], []>} : vector<128x256xbf16>, vector<256x256xbf16>, vector<128x256xf32> -> vector<128x256xf32>
      %c0_8 = arith.constant 0 : index
      %c0_9 = arith.constant 0 : index
      %15 = vector.load %arg10[%c0_8, %c0_9] : memref<128x256xf32, #tpu.memory_space<vmem>>, vector<128x256xf32>
      %c0_10 = arith.constant 0 : index
      %c0_11 = arith.constant 0 : index
      %c0_12 = arith.constant 0 : index
      %16 = vector.load %arg9[%c0_10, %c0_11, %c0_12] : memref<1x128x1xf32, #tpu.memory_space<vmem>>, vector<1x128x1xf32>
      %17 = vector.shape_cast %16 : vector<1x128x1xf32> to vector<128x1xf32>
      %c0_13 = arith.constant 0 : index
      %c0_14 = arith.constant 0 : index
      %c0_15 = arith.constant 0 : index
      %18 = vector.load %arg8[%c0_13, %c0_14, %c0_15] : memref<1x1x256xf32, #tpu.memory_space<vmem>>, vector<1x1x256xf32>
      %19 = vector.shape_cast %18 : vector<1x1x256xf32> to vector<1x256xf32>
      %20 = vector.broadcast %19 : vector<1x256xf32> to vector<128x256xf32>
      %21 = arith.addf %14, %20 : vector<128x256xf32>
      %22 = vector.broadcast %17 : vector<128x1xf32> to vector<128x256xf32>
      %23 = arith.mulf %22, %21 : vector<128x256xf32>
      %24 = arith.addf %15, %23 : vector<128x256xf32>
      %c0_16 = arith.constant 0 : index
      %c0_17 = arith.constant 0 : index
      %25 = vector.load %arg10[%c0_16, %c0_17] : memref<128x256xf32, #tpu.memory_space<vmem>>, vector<128x256xf32>
      tpu.vector_store %arg10[%c0_16, %c0_17], %24 {strides = array<i32>} : memref<128x256xf32, #tpu.memory_space<vmem>>, vector<128x256xf32>,
    } else {
    }
    return
  }
  func.func @transform_0(%arg0: i32, %arg1: i32, %arg2: i32, %arg3: i32, %arg4: memref<2x8xi32, #tpu.memory_space<smem>>, %arg5: memref<2x8xi32, #tpu.memory_space<smem>>) -> (i32, i32) {
    %c0_i32 = arith.constant 0 : i32
    return %arg0, %arg3 : i32, i32
  }
  func.func @transform_1(%arg0: i32, %arg1: i32, %arg2: i32, %arg3: i32, %arg4: memref<2x8xi32, #tpu.memory_space<smem>>, %arg5: memref<2x8xi32, #tpu.memory_space<smem>>) -> (i32, i32, i32) {
    %0 = arith.index_cast %arg0 : i32 to index
    %1 = arith.index_cast %arg2 : i32 to index
    %2 = memref.load %arg5[%0, %1] : memref<2x8xi32, #tpu.memory_space<smem>>
    %3 = arith.index_cast %arg0 : i32 to index
    %4 = arith.index_cast %arg2 : i32 to index
    %5 = memref.load %arg4[%3, %4] : memref<2x8xi32, #tpu.memory_space<smem>>
    %6 = arith.muli %2, %arg3 : i32
    %c1_i32 = arith.constant 1 : i32
    %7 = arith.subi %c1_i32, %2 : i32
    %c0_i32 = arith.constant 0 : i32
    %8 = arith.muli %7, %c0_i32 : i32
    %9 = arith.addi %6, %8 : i32
    %c0_i32_0 = arith.constant 0 : i32
    return %5, %9, %arg1 : i32, i32, i32
  }
  func.func @transform_2(%arg0: i32, %arg1: i32, %arg2: i32, %arg3: i32, %arg4: memref<2x8xi32, #tpu.memory_space<smem>>, %arg5: memref<2x8xi32, #tpu.memory_space<smem>>) -> (i32, i32, i32) {
    %c0_i32 = arith.constant 0 : i32
    %c0_i32_0 = arith.constant 0 : i32
    return %arg2, %c0_i32, %arg1 : i32, i32, i32
  }
  func.func @transform_3(%arg0: i32, %arg1: i32, %arg2: i32, %arg3: i32, %arg4: memref<2x8xi32, #tpu.memory_space<smem>>, %arg5: memref<2x8xi32, #tpu.memory_space<smem>>) -> (i32, i32, i32) {
    %c0_i32 = arith.constant 0 : i32
    %c0_i32_0 = arith.constant 0 : i32
    return %arg2, %arg0, %c0_i32 : i32, i32, i32
  }
  func.func @transform_4(%arg0: i32, %arg1: i32, %arg2: i32, %arg3: i32, %arg4: memref<2x8xi32, #tpu.memory_space<smem>>, %arg5: memref<2x8xi32, #tpu.memory_space<smem>>) -> (i32, i32) {
    %c0_i32 = arith.constant 0 : i32
    return %arg0, %arg1 : i32, i32
  }
}

</mosaic_0001>

<bundles_post_ra>
// kernel: brute_force_moe_forward.1
= control target key start
LH: loop header
LB: loop body
LE: loop exit
PB: predicated region body
PF: predicated region fallthrough
CT: control target
= control target key end

     0   :  { %s2124_s0 = inlined_call_operand.vmem [shape: s32[2,8], index: 0, kind: input, shape index: {}]   ;;  %s2125_s2 = inlined_call_operand.vmem [shape: bf16[256,256], index: 2, kind: input, shape index: {}]   ;;  %s2126_s3 = inlined_call_operand.vmem [shape: bf16[8,256,256], index: 3, kind: input, shape index: {}]   ;;  %s2127_s4 = inlined_call_operand.vmem [shape: f32[8,1,256], index: 4, kind: input, shape index: {}]   ;;  %s2128_s5 = inlined_call_operand.vmem [shape: f32[8,256,1], index: 5, kind: input, shape index: {}]   ;;  %s2129_s6 = inlined_call_operand.hbm [shape: f32[256,256], index: 6, kind: output, shape index: {}]   ;;  %s2130_s1 = inlined_call_operand.vmem [shape: s32[2,8], index: 1, kind: input, shape index: {}]  }
   0x1   :  { %2135 = sst [smem:[#allocation15_spill]] %s2125_s2  ;;  %s11_s23 = sshll.u32 %s2124_s0, 4  ;;  %s12_s23 = int_to_ptr.vmem [resolvable:$true] %s11_s23 }
   0x2   :  { %s15_s26 = sshll.u32 %s2130_s1, 4  ;;  %s1565_s27 = scalar_lea.vmem %s12_s23, 32  ;;  %s16_s26 = int_to_ptr.vmem [resolvable:$true] %s15_s26 }
   0x3   :  { %p1566_p0 = scmp.ne.s32.totalorder %s12_s23, %s1565_s27  ;;  %p1570_p1 = scmp.lt.s32.totalorder %s12_s23, %s12_s23 }
   0x4   :  { %p1571_p2 = scmp.lt.s32.totalorder %s1565_s27, %s1565_s27 }
   0x6   :  { %p1572_p3 = por %p1571_p2, %p1570_p1 }
   0x8   :  { %p1573_p4 = pnand %p1572_p3, %p1566_p0 }
   0xa   :  { %1576 = shalt.err (!%p1573_p4)  }
   0xb   :  { %s1687_s28 = smov [#allocation4]   ;;  %s1577_s29 = scalar_lea.vmem %s16_s26, 32 }
   0xc   :  { %14 = dma.vmem_to_smem %s12_s23, 32, %s1687_s28, [#allocation3] }
   0xd   :  { %p1578_p5 = scmp.ne.s32.totalorder %s16_s26, %s1577_s29  ;;  %p1582_p6 = scmp.lt.s32.totalorder %s16_s26, %s16_s26 }
   0xe   :  { %p1583_p7 = scmp.lt.s32.totalorder %s1577_s29, %s1577_s29 }
  0x10   :  { %p1584_p8 = por %p1583_p7, %p1582_p6 }
  0x12   :  { %p1585_p9 = pnand %p1584_p8, %p1578_p5 }
  0x14   :  { %1588 = shalt.err (!%p1585_p9)  }
  0x15   :  { %s1688_s0 = smov [#allocation5]  }
  0x16   :  { %18 = dma.vmem_to_smem %s16_s26, 32, %s1688_s0, [#allocation3] }
  0x17   :  { %1649 = dma.done.wait [#allocation3], 64 }
  0x18   :  { %1650 = vsyncadd [#allocation3], 4294967232 }
  0x19   :  { %20 = sfence }
  0x1a   :  { %21 = vsyncpa [#allocation7], 0 }
  0x1b   :  { %23 = vsyncpa [#allocation7 + $0x1], 0  ;;  %s1735_s1 = smov 0   ;;  %s1737_s30 = smov 0  }
  0x1c   :  { %s1739_s7 = smov 0   ;;  %s1741_s8 = smov 0  }
  0x1d   :  { %s1743_s9 = smov 0   ;;  %s1745_s10 = smov 0  }
  0x1e   :  { %s1747_s11 = smov 0   ;;  %s1749_s12 = smov 0  }
  0x1f LB: > { %2136 = sst [smem:[#allocation10_spill]] %s1677_s10  ;;  %s1302_s13 = sadd.s32 4294967295, %s1685_s12   ;;  %s1685_s12 = sphi %s1749_s12, %s29_s12   ;;  %s1681_s11 = sphi %s1747_s11, %s2149_s11   ;;  %s1677_s10 = sphi %s1745_s10, %s2153_s10   ;;  %s1673_s9 = sphi %s1743_s9, %s2147_s9   ;;  %s1669_s8 = sphi %s1741_s8, %s2146_s8   ;;  %s1665_s7 = sphi %s1739_s7, %s2152_s7   ;;  %s1661_s30 = sphi %s1737_s30, %s2151_s30   ;;  %s1657_s1 = sphi %s1735_s1, %s2150_s1  }
  0x20   : > { %2137 = sst [smem:[#allocation11_spill]] %s1681_s11  ;;  %s1303_s14 = sadd.s32 4294967294, %s1685_s12  }
  0x21   : > { %s47_s15 = sadd.s32 1, %s1677_s10  ;;  %s55_s16 = sadd.s32 1, %s1681_s11 }
  0x22   : > { %p49_p10 = scmp.ge.s32.totalorder %s47_s15, 8  ;;  %p208_p11 = scmp.ne.s32.totalorder %s1665_s7, %s1661_s30 }
  0x23   : > { %p209_p12 = scmp.eq.s32.totalorder %s1302_s13, 15  ;;  %p214_p0 = scmp.ne.s32.totalorder %s1661_s30, %s1657_s1 }
  0x24   : > { %s2155_s15 = smov (%p49_p10, %s47_s15), 0  ;;  %s2157_s16 = smov (!%p49_p10, %s55_s16), %s1681_s11 }
  0x25   : > { %2138 = sst [smem:[#allocation12_spill]] %s2155_s15  ;;  %p1784_p13 = por %p209_p12, %p208_p11 }
  0x26   : > { %p57_p1 = scmp.ge.s32.totalorder %s2157_s16, 2  ;;  %p215_p2 = scmp.eq.s32.totalorder %s1303_s14, 15 }
  0x27   : > { %p1308_p3 = scmp.ge.s32.totalorder %s1685_s12, 1  ;;  %p312_p4 = scmp.lt.s32.totalorder %s1685_s12, 17 }
  0x28   : > { %s2159_s16 = smov (%p57_p1, %s2157_s16), 0  ;;  %p1794_p5 = por %p215_p2, %p214_p0 }
  0x29   : > { %2140 = sst [smem:[#allocation13_spill]] %s2159_s16  ;;  %p313_p6 = pnand %p1308_p3, %p312_p4 }
  0x2a   : > { %s193_s19 = ssub.s32 %s1681_s11, %s2159_s16  ;;  %s198_s20 = sadd.s32 1, %s1665_s7 }
  0x2b   : > { %p196_p7 = scmp.eq.s32.totalorder %s193_s19, 0  ;;  %316 = sbr.rel (%p313_p6) target bundleno = 420 (0x1a4), region = 36 }
  0x2c   : > { %s2131_s22 = sand.u32 (!%p313_p6), 1, %s1661_s30   ;;  %s1310_s23 = sshll.u32 (!%p313_p6), %s1673_s9, 4 }
  0x2d   : > { %s1802_s21 = scalar_select %p196_p7, %s1665_s7, %s198_s20  }
  0x2e   : > { %s1309_s24 = sshll.u32 (!%p313_p6), %s2131_s22, 8  ;;  %p386_p8 = scmp.lt.s32.totalorder (!%p313_p6), %s1310_s23, 31 }
  0x2f   : > { %2142 = sst [smem:[#allocation14_spill]] %s1802_s21  ;;  %s396_s25 = sshra.s32 (!%p313_p6), %s1669_s8, 7 }
  0x30   : > { %s398_s26 = sadd.s32 (!%p313_p6), %s1673_s9, %s396_s25  ;;  %s401_s27 = sand.u32 (!%p313_p6), 127, %s1669_s8 }
  0x31   : > { %s1313_s29 = sshll.u32 (!%p313_p6), %s398_s26, 7  ;;  %s2143_s2 = sld [smem:[#allocation15_spill]] (!%p313_p6) }
  0x32   : > { %s2161_s23 = smov (!%p386_p8, %s1310_s23), 31  ;;  %s1816_s19 = sadd.s32 %s1313_s29, %s401_s27 }
  0x33   : > { %s1377_s28 = sshll.u32 %s2161_s23, 3  ;;  %s404_s20 = sld [smem:[#allocation4 + %s1816_s19]] }
  0x34   : > { %p433_p9 = scmp.lt.s32.totalorder %s1669_s8, 7  ;;  %p453_p10 = scmp.eq.s32.totalorder %s1669_s8, 0 }
  0x35   : > { %v1689_v0 = vmov (%p453_p10), 0.0  }
  0x36   : > { %s2163_s8 = smov (!%p433_p9, %s1669_s8), 7 }
  0x37   : > { %s1814_s14 = scalar_lea.vmem %s2143_s2, %s1377_s28  ;;  %s1316_s22 = sshll.u32 %s2163_s8, 1 }
  0x38   : > { %s1318_s16 = sshll.u32 %s2163_s8, 5  ;;  %s1825_s25 = scalar_lea.vmem %s2127_s4, %s1316_s22 }
  0x39   : > { %s447_s26 = sadd.s32 %s1318_s16, %s2161_s23  ;;  %p408_p11 = scmp.lt.s32.totalorder %s404_s20, 7 }
  0x3a   : > { %s1319_s10 = sshll.u32 %s447_s26, 3  ;;  %s1837_s8 = scalar_lea.vmem [#allocation6], %s1309_s24 }
  0x3b   : > { %s1830_s27 = scalar_lea.vmem %s2128_s5, %s1319_s10  ;;  %s2165_s20 = smov (!%p408_p11, %s404_s20), 7  ;;  %459 = vst [vmem:[%s1837_s8] sm:$0xff] (%p453_p10), %v1689_v0  ;;  %460 = vst [vmem:[%s1837_s8 + $0x8] sm:$0xff] (%p453_p10), %v1689_v0 }
  0x3c   : > { %s1378_s29 = sshll.u32 %s2165_s20, 8  ;;  %458 = sbr.rel (!%p453_p10) target bundleno = 75 (0x4b), region = 40  ;;  %461 = vst [vmem:[%s1837_s8 + $0x10] sm:$0xff] (%p453_p10), %v1689_v0  ;;  %462 = vst [vmem:[%s1837_s8 + $0x18] sm:$0xff] (%p453_p10), %v1689_v0 }
  0x3d   : > { %s1835_s21 = scalar_lea.vmem %s2126_s3, %s1378_s29  ;;  %463 = vst [vmem:[%s1837_s8 + $0x20] sm:$0xff] (%p453_p10), %v1689_v0  ;;  %464 = vst [vmem:[%s1837_s8 + $0x28] sm:$0xff] (%p453_p10), %v1689_v0 }
  0x3e   : > { %465 = vst [vmem:[%s1837_s8 + $0x30] sm:$0xff] (%p453_p10), %v1689_v0  ;;  %466 = vst [vmem:[%s1837_s8 + $0x38] sm:$0xff] (%p453_p10), %v1689_v0 }
  0x3f   : > { %467 = vst [vmem:[%s1837_s8 + $0x40] sm:$0xff] (%p453_p10), %v1689_v0  ;;  %468 = vst [vmem:[%s1837_s8 + $0x48] sm:$0xff] (%p453_p10), %v1689_v0 }
  0x40   : > { %469 = vst [vmem:[%s1837_s8 + $0x50] sm:$0xff] (%p453_p10), %v1689_v0  ;;  %470 = vst [vmem:[%s1837_s8 + $0x58] sm:$0xff] (%p453_p10), %v1689_v0 }
  0x41   : > { %471 = vst [vmem:[%s1837_s8 + $0x60] sm:$0xff] (%p453_p10), %v1689_v0  ;;  %472 = vst [vmem:[%s1837_s8 + $0x68] sm:$0xff] (%p453_p10), %v1689_v0 }
  0x42   : > { %473 = vst [vmem:[%s1837_s8 + $0x70] sm:$0xff] (%p453_p10), %v1689_v0  ;;  %474 = vst [vmem:[%s1837_s8 + $0x78] sm:$0xff] (%p453_p10), %v1689_v0 }
  0x43   : > { %475 = vst [vmem:[%s1837_s8 + $0x80] sm:$0xff] %v1689_v0  ;;  %476 = vst [vmem:[%s1837_s8 + $0x88] sm:$0xff] %v1689_v0 }
  0x44   : > { %477 = vst [vmem:[%s1837_s8 + $0x90] sm:$0xff] %v1689_v0  ;;  %478 = vst [vmem:[%s1837_s8 + $0x98] sm:$0xff] %v1689_v0 }
  0x45   : > { %479 = vst [vmem:[%s1837_s8 + $0xa0] sm:$0xff] %v1689_v0  ;;  %480 = vst [vmem:[%s1837_s8 + $0xa8] sm:$0xff] %v1689_v0 }
  0x46   : > { %481 = vst [vmem:[%s1837_s8 + $0xb0] sm:$0xff] %v1689_v0  ;;  %482 = vst [vmem:[%s1837_s8 + $0xb8] sm:$0xff] %v1689_v0 }
  0x47   : > { %483 = vst [vmem:[%s1837_s8 + $0xc0] sm:$0xff] %v1689_v0  ;;  %484 = vst [vmem:[%s1837_s8 + $0xc8] sm:$0xff] %v1689_v0 }
  0x48   : > { %485 = vst [vmem:[%s1837_s8 + $0xd0] sm:$0xff] %v1689_v0  ;;  %486 = vst [vmem:[%s1837_s8 + $0xd8] sm:$0xff] %v1689_v0 }
  0x49   : > { %487 = vst [vmem:[%s1837_s8 + $0xe0] sm:$0xff] %v1689_v0  ;;  %488 = vst [vmem:[%s1837_s8 + $0xe8] sm:$0xff] %v1689_v0 }
  0x4a   : > { %489 = vst [vmem:[%s1837_s8 + $0xf0] sm:$0xff] %v1689_v0  ;;  %490 = vst [vmem:[%s1837_s8 + $0xf8] sm:$0xff] %v1689_v0 }
  0x4b PF: > { %s498_s2 = sld [smem:[#allocation5 + %s1816_s19]] }
  0x51   : > { %p1322_p12 = scmp.le.s32.totalorder %s498_s2, 0 }
  0x52   : > { %v1493_v1 = vld [vmem:[%s1835_s21 + $0x4] ss:$8 sps:$4 sm:$0xff] (!%p1322_p12)   ;;  %v1495_v2 = vld [vmem:[%s1835_s21] ss:$8 sps:$4 sm:$0xff] (!%p1322_p12)   ;;  %v1690_v3 = vmov (!%p1322_p12), 0   ;;  %v585_v23 = vld [vmem:[%s1830_s27 + $0x10] sm:$0xff] (!%p1322_p12) }
  0x53   : > { %502 = sbr.rel (%p1322_p12) target bundleno = 394 (0x18a), region = 44  ;;  %1492 = vset.pattern.permute.xlu1 (!%p1322_p12), %v1690_v3  ;;  %1491 = vset.pattern.permute.xlu0 (!%p1322_p12), %v1690_v3  ;;  %v1496_v4 = vld [vmem:[%s1835_s21 + $0x14] ss:$8 sps:$4 sm:$0xff] (!%p1322_p12)   ;;  %v1498_v5 = vld [vmem:[%s1835_s21 + $0x10] ss:$8 sps:$4 sm:$0xff] (!%p1322_p12)   ;;  %v583_v24 = vld [vmem:[%s1830_s27] sm:$0xff] (!%p1322_p12) }
  0x54   : > { %851 = vmatprep.subr.bf16.mxu0 (!%p1322_p12), %v1493_v1  ;;  %1382 = vmatprep.subr.bf16.mxu1 (!%p1322_p12), %v1493_v1  ;;  %v1499_v6 = vld [vmem:[%s1835_s21 + $0x24] ss:$8 sps:$4 sm:$0xff] (!%p1322_p12)   ;;  %v1501_v7 = vld [vmem:[%s1835_s21 + $0x20] ss:$8 sps:$4 sm:$0xff] (!%p1322_p12)   ;;  %v1502_v8 = vld [vmem:[%s1835_s21 + $0x34] ss:$8 sps:$4 sm:$0xff] (!%p1322_p12)  }
  0x55   : > { %852 = vmatpush1.bf16.msra.mxu0 (!%p1322_p12), %v1495_v2  ;;  %1398 = vmatpush1.bf16.msra.mxu1 (!%p1322_p12), %v1495_v2  ;;  %v1504_v9 = vld [vmem:[%s1835_s21 + $0x30] ss:$8 sps:$4 sm:$0xff] (!%p1322_p12)   ;;  %v1505_v10 = vld [vmem:[%s1835_s21 + $0x44] ss:$8 sps:$4 sm:$0xff] (!%p1322_p12)   ;;  %v1507_v11 = vld [vmem:[%s1835_s21 + $0x40] ss:$8 sps:$4 sm:$0xff] (!%p1322_p12)  }
  0x56   : > { %853 = vmatprep.subr.bf16.mxu0 (!%p1322_p12), %v1496_v4  ;;  %1383 = vmatprep.subr.bf16.mxu1 (!%p1322_p12), %v1496_v4  ;;  %v1508_v12 = vld [vmem:[%s1835_s21 + $0x54] ss:$8 sps:$4 sm:$0xff] (!%p1322_p12)   ;;  %v1510_v13 = vld [vmem:[%s1835_s21 + $0x50] ss:$8 sps:$4 sm:$0xff] (!%p1322_p12)   ;;  %v1511_v14 = vld [vmem:[%s1835_s21 + $0x64] ss:$8 sps:$4 sm:$0xff] (!%p1322_p12)  }
  0x57   : > { %v1543_v15 = vld [vmem:[%s1814_s14 + $0x4] ss:$8 sps:$4 sm:$0xff] (!%p1322_p12)   ;;  %v1513_v16 = vld [vmem:[%s1835_s21 + $0x60] ss:$8 sps:$4 sm:$0xff] (!%p1322_p12)   ;;  %v1514_v18 = vld [vmem:[%s1835_s21 + $0x74] ss:$8 sps:$4 sm:$0xff] (!%p1322_p12)   ;;  %976 = vperm.xlu1 (!%p1322_p12), %1492, %v585_v23   ;;  %966 = vperm.xlu0 (!%p1322_p12), %1491, %v583_v24  }
  0x58   : > { %v1546_v17 = vld [vmem:[%s1814_s14 + $0x44] ss:$8 sps:$4 sm:$0xff] (!%p1322_p12)   ;;  %883 = vmatprep.mubr.bf16.mxu0 (!%p1322_p12), %v1543_v15  ;;  %v1516_v19 = vld [vmem:[%s1835_s21 + $0x70] ss:$8 sps:$4 sm:$0xff] (!%p1322_p12)   ;;  %v1519_v21 = vld [vmem:[%s1835_s21 + $0x80] ss:$8 sps:$4 sm:$0xff] (!%p1322_p12)  }
  0x59   : > { %854 = vmatpush1.bf16.msra.mxu0 (!%p1322_p12), %v1498_v5  ;;  %1399 = vmatpush1.bf16.msra.mxu1 (!%p1322_p12), %v1498_v5  ;;  %v1517_v20 = vld [vmem:[%s1835_s21 + $0x84] ss:$8 sps:$4 sm:$0xff] (!%p1322_p12)   ;;  %v1520_v22 = vld [vmem:[%s1835_s21 + $0x94] ss:$8 sps:$4 sm:$0xff] (!%p1322_p12)   ;;  %v1522_v27 = vld [vmem:[%s1835_s21 + $0x90] ss:$8 sps:$4 sm:$0xff] (!%p1322_p12)   ;;  %v601_v5 = vlaneseq (!%p1322_p12) }
  0x5a   : > { %855 = vmatprep.subr.bf16.mxu0 %v1499_v6  ;;  %1384 = vmatprep.subr.bf16.mxu1 %v1499_v6  ;;  %v586_v25 = vld [vmem:[%s1830_s27 + $0x18] sm:$0xff]  ;;  %v584_v26 = vld [vmem:[%s1830_s27 + $0x8] sm:$0xff]  ;;  %v587_v30 = vld [vmem:[%s1830_s27 + $0x20] sm:$0xff] }
  0x5b   : > { %923 = vmatprep.mubr.bf16.mxu1 %v1546_v17  ;;  %v1523_v28 = vld [vmem:[%s1835_s21 + $0xa4] ss:$8 sps:$4 sm:$0xff]   ;;  %981 = vperm.xlu1 %1492, %v586_v25   ;;  %v1525_v31 = vld [vmem:[%s1835_s21 + $0xa0] ss:$8 sps:$4 sm:$0xff]   ;;  %v1526_v32 = vld [vmem:[%s1835_s21 + $0xb4] ss:$8 sps:$4 sm:$0xff]  }
  0x5c   : > { %971 = vperm.xlu0 %1491, %v584_v26   ;;  %v588_v29 = vld [vmem:[%s1830_s27 + $0x28] sm:$0xff]  ;;  %v590_v33 = vld [vmem:[%s1830_s27 + $0x38] sm:$0xff]  ;;  %v589_v34 = vld [vmem:[%s1830_s27 + $0x30] sm:$0xff] }
  0x5d   : > { %856 = vmatpush1.bf16.msra.mxu0 %v1501_v7  ;;  %1400 = vmatpush1.bf16.msra.mxu1 %v1501_v7  ;;  %v1528_v35 = vld [vmem:[%s1835_s21 + $0xb0] ss:$8 sps:$4 sm:$0xff]   ;;  %v1529_v36 = vld [vmem:[%s1835_s21 + $0xc4] ss:$8 sps:$4 sm:$0xff]   ;;  %v1531_v39 = vld [vmem:[%s1835_s21 + $0xc0] ss:$8 sps:$4 sm:$0xff]  }
  0x5e   : > { %857 = vmatprep.subr.bf16.mxu0 %v1502_v8  ;;  %1385 = vmatprep.subr.bf16.mxu1 %v1502_v8  ;;  %v592_v37 = vld [vmem:[%s1830_s27 + $0x48] sm:$0xff]  ;;  %v591_v38 = vld [vmem:[%s1830_s27 + $0x40] sm:$0xff]  ;;  %v1532_v40 = vld [vmem:[%s1835_s21 + $0xd4] ss:$8 sps:$4 sm:$0xff]   ;;  %v602_v8 = vshrl.u32 %v601_v5, 7 }
  0x5f   : > { %991 = vperm.xlu1 %1492, %v588_v29   ;;  %v594_v41 = vld [vmem:[%s1830_s27 + $0x58] sm:$0xff]  ;;  %v593_v42 = vld [vmem:[%s1830_s27 + $0x50] sm:$0xff]  ;;  %v1535_v44 = vld [vmem:[%s1835_s21 + $0xe4] ss:$8 sps:$4 sm:$0xff]  }
  0x60   : > { %986 = vperm.xlu0 %1491, %v587_v30   ;;  %v1534_v43 = vld [vmem:[%s1835_s21 + $0xd0] ss:$8 sps:$4 sm:$0xff]   ;;  %v596_v45 = vld [vmem:[%s1830_s27 + $0x68] sm:$0xff]  ;;  %v595_v46 = vld [vmem:[%s1830_s27 + $0x60] sm:$0xff] }
  0x61   : > { %858 = vmatpush1.bf16.msra.mxu0 %v1504_v9  ;;  %1401 = vmatpush1.bf16.msra.mxu1 %v1504_v9  ;;  %v1537_v47 = vld [vmem:[%s1835_s21 + $0xe0] ss:$8 sps:$4 sm:$0xff]   ;;  %v1538_v48 = vld [vmem:[%s1835_s21 + $0xf4] ss:$8 sps:$4 sm:$0xff]   ;;  %v1540_v51 = vld [vmem:[%s1835_s21 + $0xf0] ss:$8 sps:$4 sm:$0xff]  }
  0x62   : > { %859 = vmatprep.subr.bf16.mxu0 %v1505_v10  ;;  %1386 = vmatprep.subr.bf16.mxu1 %v1505_v10  ;;  %v598_v49 = vld [vmem:[%s1830_s27 + $0x78] sm:$0xff]  ;;  %v597_v50 = vld [vmem:[%s1830_s27 + $0x70] sm:$0xff]  ;;  %v1541_v52 = vld [vmem:[%s1814_s14] ss:$8 sps:$4 sm:$0xff]  }
  0x63   : > { %1001 = vperm.xlu1 %1492, %v590_v33   ;;  %v1544_v53 = vld [vmem:[%s1814_s14 + $0x40] ss:$8 sps:$4 sm:$0xff]   ;;  %v1547_v54 = vld [vmem:[%s1814_s14 + $0x14] ss:$8 sps:$4 sm:$0xff]   ;;  %v1551_v56 = vld [vmem:[%s1814_s14 + $0x10] ss:$8 sps:$4 sm:$0xff]  }
  0x64   : > { %996 = vperm.xlu0 %1491, %v589_v34   ;;  %v1549_v55 = vld [vmem:[%s1814_s14 + $0x54] ss:$8 sps:$4 sm:$0xff]   ;;  %v1552_v57 = vld [vmem:[%s1814_s14 + $0x50] ss:$8 sps:$4 sm:$0xff]   ;;  %v1553_v58 = vld [vmem:[%s1814_s14 + $0x24] ss:$8 sps:$4 sm:$0xff]  }
  0x65   : > { %860 = vmatpush1.bf16.msra.mxu0 %v1507_v11  ;;  %1402 = vmatpush1.bf16.msra.mxu1 %v1507_v11  ;;  %v1555_v59 = vld [vmem:[%s1814_s14 + $0x64] ss:$8 sps:$4 sm:$0xff]   ;;  %v1557_v60 = vld [vmem:[%s1814_s14 + $0x20] ss:$8 sps:$4 sm:$0xff]   ;;  %v1559_v62 = vld [vmem:[%s1814_s14 + $0x34] ss:$8 sps:$4 sm:$0xff]  }
  0x66   : > { %861 = vmatprep.subr.bf16.mxu0 %v1508_v12  ;;  %1387 = vmatprep.subr.bf16.mxu1 %v1508_v12  ;;  %v1558_v61 = vld [vmem:[%s1814_s14 + $0x60] ss:$8 sps:$4 sm:$0xff]   ;;  %v1561_v63 = vld [vmem:[%s1814_s14 + $0x74] ss:$8 sps:$4 sm:$0xff]   ;;  %v1563_v0 = vld [vmem:[%s1814_s14 + $0x30] ss:$8 sps:$4 sm:$0xff]  }
  0x67   : > { %1011 = vperm.xlu1 %1492, %v592_v37   ;;  %v1564_v1 = vld [vmem:[%s1814_s14 + $0x70] ss:$8 sps:$4 sm:$0xff]   ;;  %v603_v11 = vsub.s32 0, %v602_v8  ;;  %v599_v12 = vld [vmem:[%s1825_s25] sm:$0x3]  ;;  %v568_v33 = vld [vmem:[%s1837_s8 + $0x88] sm:$0xff] }
  0x68   : > { %1006 = vperm.xlu0 %1491, %v591_v38   ;;  %v551_v24 = vld [vmem:[%s1837_s8] sm:$0xff] }
  0x69   : > { %862 = vmatpush1.bf16.msra.mxu0 %v1510_v13  ;;  %1403 = vmatpush1.bf16.msra.mxu1 %v1510_v13  ;;  %v607_v13 = vsub.s32 1, %v602_v8  ;;  %v567_v25 = vld [vmem:[%s1837_s8 + $0x80] sm:$0xff] }
  0x6a   : > { %863 = vmatprep.subr.bf16.mxu0 %v1511_v14  ;;  %1388 = vmatprep.subr.bf16.mxu1 %v1511_v14  ;;  %v1947_v14 = vrot.slane %v599_v12, %v603_v11 }
  0x6b   : > { %1021 = vperm.xlu1 %1492, %v594_v41   ;;  %v553_v41 = vld [vmem:[%s1837_s8 + $0x10] sm:$0xff] }
  0x6c   : > { %1016 = vperm.xlu0 %1491, %v593_v42   ;;  %v569_v42 = vld [vmem:[%s1837_s8 + $0x90] sm:$0xff] }
  0x6d   : > { %864 = vmatpush1.bf16.msra.mxu0 %v1513_v16  ;;  %1404 = vmatpush1.bf16.msra.mxu1 %v1513_v16  ;;  %v1951_v16 = vrot.slane %v599_v12, %v607_v13 }
  0x6e   : > { %865 = vmatprep.subr.bf16.mxu0 %v1514_v18  ;;  %1389 = vmatprep.subr.bf16.mxu1 %v1514_v18 }
  0x6f   : > { %1031 = vperm.xlu1 %1492, %v596_v45  }
  0x70   : > { %1026 = vperm.xlu0 %1491, %v595_v46  }
  0x71   : > { %866 = vmatpush1.bf16.msra.mxu0 %v1516_v19  ;;  %1405 = vmatpush1.bf16.msra.mxu1 %v1516_v19 }
  0x72   : > { %867 = vmatprep.subr.bf16.mxu0 %v1517_v20  ;;  %1390 = vmatprep.subr.bf16.mxu1 %v1517_v20 }
  0x73   : > { %1041 = vperm.xlu1 %1492, %v598_v49   ;;  %v554_v49 = vld [vmem:[%s1837_s8 + $0x18] sm:$0xff] }
  0x74   : > { %1036 = vperm.xlu0 %1491, %v597_v50   ;;  %v570_v50 = vld [vmem:[%s1837_s8 + $0x98] sm:$0xff] }
  0x75   : > { %868 = vmatpush1.bf16.msra.mxu0 %v1519_v21  ;;  %1406 = vmatpush1.bf16.msra.mxu1 %v1519_v21 }
  0x76   : > { %869 = vmatprep.subr.bf16.mxu0 %v1520_v22  ;;  %1391 = vmatprep.subr.bf16.mxu1 %v1520_v22 }
  0x79   : > { %870 = vmatpush1.bf16.msra.mxu0 %v1522_v27  ;;  %1407 = vmatpush1.bf16.msra.mxu1 %v1522_v27 }
  0x7a   : > { %871 = vmatprep.subr.bf16.mxu0 %v1523_v28  ;;  %1392 = vmatprep.subr.bf16.mxu1 %v1523_v28 }
  0x7d   : > { %872 = vmatpush1.bf16.msra.mxu0 %v1525_v31  ;;  %1408 = vmatpush1.bf16.msra.mxu1 %v1525_v31 }
  0x7e   : > { %873 = vmatprep.subr.bf16.mxu0 %v1526_v32  ;;  %1393 = vmatprep.subr.bf16.mxu1 %v1526_v32  ;;  %v552_v32 = vld [vmem:[%s1837_s8 + $0x8] sm:$0xff] }
  0x81   : > { %874 = vmatpush1.bf16.msra.mxu0 %v1528_v35  ;;  %1409 = vmatpush1.bf16.msra.mxu1 %v1528_v35 }
  0x82   : > { %875 = vmatprep.subr.bf16.mxu0 %v1529_v36  ;;  %1394 = vmatprep.subr.bf16.mxu1 %v1529_v36 }
  0x85   : > { %876 = vmatpush1.bf16.msra.mxu0 %v1531_v39  ;;  %1410 = vmatpush1.bf16.msra.mxu1 %v1531_v39 }
  0x86   : > { %877 = vmatprep.subr.bf16.mxu0 %v1532_v40  ;;  %1395 = vmatprep.subr.bf16.mxu1 %v1532_v40 }
  0x89   : > { %878 = vmatpush1.bf16.msra.mxu0 %v1534_v43  ;;  %1411 = vmatpush1.bf16.msra.mxu1 %v1534_v43 }
  0x8a   : > { %879 = vmatprep.subr.bf16.mxu0 %v1535_v44  ;;  %1396 = vmatprep.subr.bf16.mxu1 %v1535_v44 }
  0x8d   : > { %880 = vmatpush1.bf16.msra.mxu0 %v1537_v47  ;;  %1412 = vmatpush1.bf16.msra.mxu1 %v1537_v47 }
  0x8e   : > { %881 = vmatprep.subr.bf16.mxu0 %v1538_v48  ;;  %1397 = vmatprep.subr.bf16.mxu1 %v1538_v48 }
  0x91   : > { %882 = vmatpush1.bf16.msra.mxu0 %v1540_v51  ;;  %1413 = vmatpush1.bf16.msra.mxu1 %v1540_v51 }
  0x94   : > { %884 = vmatmul.mubr.bf16.vlgmr.msra.gmra.mrb[0].mxu0 %v1541_v52  ;;  %924 = vmatmul.mubr.bf16.vlgmr.msra.gmra.mrb[0].mxu1 %v1544_v53 }
  0x95   : > { %893 = vmatprep.mubr.bf16.mxu0 %v1547_v54  ;;  %933 = vmatprep.mubr.bf16.mxu1 %v1549_v55 }
  0x9c   : > { %894 = vmatmul.mubr.bf16.gmra.mrb[4].mxu0 %v1551_v56  ;;  %934 = vmatmul.mubr.bf16.gmra.mrb[4].mxu1 %v1552_v57 }
  0x9d   : > { %903 = vmatprep.mubr.bf16.mxu0 %v1553_v58  ;;  %943 = vmatprep.mubr.bf16.mxu1 %v1555_v59 }
  0xa4   : > { %904 = vmatmul.mubr.bf16.gmra.mrb[8].mxu0 %v1557_v60  ;;  %944 = vmatmul.mubr.bf16.gmra.mrb[8].mxu1 %v1558_v61 }
  0xa5   : > { %913 = vmatprep.mubr.bf16.mxu0 %v1559_v62  ;;  %953 = vmatprep.mubr.bf16.mxu1 %v1561_v63 }
  0xac   : > { %914 = vmatmul.mubr.bf16.gmra.mrb[12].mxu0 %v1563_v0  ;;  %954 = vmatmul.mubr.bf16.gmra.mrb[12].mxu1 %v1564_v1 }
  0xd6   : > { %v967_v2 = vpop.permute.xlu0 %966  ;;  %v1936_v3 = vpop.permute.xlu1 %976 }
  0xda   : > { %v1938_v6 = vpop.permute.xlu1 %981 }
  0xdb   : > { %v972_v4 = vpop.permute.xlu0 %971 }
  0xde   : > { %v1942_v9 = vpop.permute.xlu1 %991 }
  0xdf   : > { %v1940_v7 = vpop.permute.xlu0 %986 }
  0xe2   : > { %v1949_v15 = vpop.permute.xlu1 %1001 }
  0xe3   : > { %v1944_v10 = vpop.permute.xlu0 %996 }
  0xe6   : > { %v1012_v38 = vpop.permute.xlu1 %1011 }
  0xe7   : > { %v1007_v17 = vpop.permute.xlu0 %1006 }
  0xeb   : > { %v1017_v55 = vpop.permute.xlu0 %1016 }
 0x167   : > { %v885_v18 = vpop.f32.mrb[0].mxu0  ;;  %v925_v19 = vpop.f32.mrb[0].mxu1 }
 0x168   : > { %v886_v20 = vadd.f32 %v885_v18, %v1947_v14  ;;  %v926_v21 = vadd.f32 %v925_v19, %v1947_v14  ;;  %v887_v22 = vpop.f32.mrb[1].mxu0  ;;  %v927_v23 = vpop.f32.mrb[1].mxu1  ;;  %v556_v18 = vld [vmem:[%s1837_s8 + $0x28] sm:$0xff] }
 0x169   : > { %v888_v26 = vadd.f32 %v887_v22, %v1951_v16  ;;  %v928_v27 = vadd.f32 %v927_v23, %v1951_v16  ;;  %v889_v28 = vpop.f32.mrb[2].mxu0  ;;  %v929_v29 = vpop.f32.mrb[2].mxu1  ;;  %v572_v19 = vld [vmem:[%s1837_s8 + $0xa8] sm:$0xff] }
 0x16a   : > { %v1044_v30 = vmul.f32 %v967_v2, %v886_v20  ;;  %v1060_v31 = vmul.f32 %v1007_v17, %v926_v21  ;;  %v890_v34 = vadd.f32 %v889_v28, %v1947_v14  ;;  %v930_v35 = vadd.f32 %v929_v29, %v1947_v14  ;;  %v891_v36 = vpop.f32.mrb[3].mxu0  ;;  %v931_v37 = vpop.f32.mrb[3].mxu1  ;;  %v573_v28 = vld [vmem:[%s1837_s8 + $0xb0] sm:$0xff] }
 0x16b   : > { %v1045_v39 = vmul.f32 %v967_v2, %v888_v26  ;;  %v1061_v40 = vmul.f32 %v1007_v17, %v928_v27  ;;  %v892_v43 = vadd.f32 %v891_v36, %v1951_v16  ;;  %v932_v44 = vadd.f32 %v931_v37, %v1951_v16  ;;  %v555_v2 = vld [vmem:[%s1837_s8 + $0x20] sm:$0xff]  ;;  %v557_v27 = vld [vmem:[%s1837_s8 + $0x30] sm:$0xff]  ;;  %v574_v36 = vld [vmem:[%s1837_s8 + $0xb8] sm:$0xff] }
 0x16c   : > { %v1076_v45 = vadd.f32 %v1044_v30, %v551_v24  ;;  %v1092_v46 = vadd.f32 %v1060_v31, %v567_v25  ;;  %v1046_v47 = vmul.f32 %v972_v4, %v890_v34  ;;  %v1062_v48 = vmul.f32 %v1012_v38, %v930_v35  ;;  %v1022_v24 = vpop.permute.xlu1 %1021  ;;  %v558_v35 = vld [vmem:[%s1837_s8 + $0x38] sm:$0xff] }
 0x16d   : > { %v1077_v51 = vadd.f32 %v1045_v39, %v552_v32  ;;  %v1093_v52 = vadd.f32 %v1061_v40, %v568_v33  ;;  %v1047_v53 = vmul.f32 %v972_v4, %v892_v43  ;;  %v1063_v54 = vmul.f32 %v1012_v38, %v932_v44  ;;  %v571_v4 = vld [vmem:[%s1837_s8 + $0xa0] sm:$0xff]  ;;  %v1027_v40 = vpop.permute.xlu0 %1026 }
 0x16e   : > { %1108 = vst [vmem:[%s1837_s8] sm:$0xff] %v1076_v45  ;;  %1124 = vst [vmem:[%s1837_s8 + $0x80] sm:$0xff] %v1092_v46  ;;  %v1078_v56 = vadd.f32 %v1046_v47, %v553_v41  ;;  %v1094_v57 = vadd.f32 %v1062_v48, %v569_v42 }
 0x16f   : > { %1109 = vst [vmem:[%s1837_s8 + $0x8] sm:$0xff] %v1077_v51  ;;  %1125 = vst [vmem:[%s1837_s8 + $0x88] sm:$0xff] %v1093_v52  ;;  %v1079_v58 = vadd.f32 %v1047_v53, %v554_v49  ;;  %v1095_v59 = vadd.f32 %v1063_v54, %v570_v50  ;;  %v895_v60 = vpop.f32.mrb[4].mxu0  ;;  %v935_v61 = vpop.f32.mrb[4].mxu1  ;;  %v559_v50 = vld [vmem:[%s1837_s8 + $0x40] sm:$0xff] }
 0x170   : > { %1110 = vst [vmem:[%s1837_s8 + $0x10] sm:$0xff] %v1078_v56  ;;  %1126 = vst [vmem:[%s1837_s8 + $0x90] sm:$0xff] %v1094_v57  ;;  %v896_v62 = vadd.f32 %v895_v60, %v1947_v14  ;;  %v936_v63 = vadd.f32 %v935_v61, %v1947_v14  ;;  %v897_v0 = vpop.f32.mrb[5].mxu0  ;;  %v937_v1 = vpop.f32.mrb[5].mxu1  ;;  %v575_v51 = vld [vmem:[%s1837_s8 + $0xc0] sm:$0xff] }
 0x171   : > { %1111 = vst [vmem:[%s1837_s8 + $0x18] sm:$0xff] %v1079_v58  ;;  %1127 = vst [vmem:[%s1837_s8 + $0x98] sm:$0xff] %v1095_v59  ;;  %v898_v5 = vadd.f32 %v897_v0, %v1951_v16  ;;  %v938_v8 = vadd.f32 %v937_v1, %v1951_v16  ;;  %v899_v11 = vpop.f32.mrb[6].mxu0  ;;  %v939_v12 = vpop.f32.mrb[6].mxu1  ;;  %v560_v58 = vld [vmem:[%s1837_s8 + $0x48] sm:$0xff] }
 0x172   : > { %v1048_v13 = vmul.f32 %v1936_v3, %v896_v62  ;;  %v1064_v17 = vmul.f32 %v1017_v55, %v936_v63  ;;  %v900_v20 = vadd.f32 %v899_v11, %v1947_v14  ;;  %v940_v21 = vadd.f32 %v939_v12, %v1947_v14  ;;  %v901_v22 = vpop.f32.mrb[7].mxu0  ;;  %v941_v23 = vpop.f32.mrb[7].mxu1  ;;  %v576_v59 = vld [vmem:[%s1837_s8 + $0xc8] sm:$0xff] }
 0x173   : > { %v1049_v25 = vmul.f32 %v1936_v3, %v898_v5  ;;  %v1065_v26 = vmul.f32 %v1017_v55, %v938_v8  ;;  %v902_v29 = vadd.f32 %v901_v22, %v1951_v16  ;;  %v942_v30 = vadd.f32 %v941_v23, %v1951_v16  ;;  %v1032_v0 = vpop.permute.xlu1 %1031  ;;  %v577_v5 = vld [vmem:[%s1837_s8 + $0xd0] sm:$0xff] }
 0x174   : > { %v1080_v31 = vadd.f32 %v1048_v13, %v555_v2  ;;  %v1096_v32 = vadd.f32 %v1064_v17, %v571_v4  ;;  %v1050_v33 = vmul.f32 %v1938_v6, %v900_v20  ;;  %v1066_v34 = vmul.f32 %v1022_v24, %v940_v21  ;;  %v561_v4 = vld [vmem:[%s1837_s8 + $0x50] sm:$0xff]  ;;  %v578_v20 = vld [vmem:[%s1837_s8 + $0xd8] sm:$0xff] }
 0x175   : > { %v1081_v3 = vadd.f32 %v1049_v25, %v556_v18  ;;  %v1097_v37 = vadd.f32 %v1065_v26, %v572_v19  ;;  %v1051_v38 = vmul.f32 %v1938_v6, %v902_v29  ;;  %v1067_v39 = vmul.f32 %v1022_v24, %v942_v30  ;;  %v562_v19 = vld [vmem:[%s1837_s8 + $0x58] sm:$0xff]  ;;  %v1037_v24 = vpop.permute.xlu0 %1036 }
 0x176   : > { %1112 = vst [vmem:[%s1837_s8 + $0x20] sm:$0xff] %v1080_v31  ;;  %1128 = vst [vmem:[%s1837_s8 + $0xa0] sm:$0xff] %v1096_v32  ;;  %v1082_v41 = vadd.f32 %v1050_v33, %v557_v27  ;;  %v1098_v42 = vadd.f32 %v1066_v34, %v573_v28  ;;  %v563_v34 = vld [vmem:[%s1837_s8 + $0x60] sm:$0xff] }
 0x177   : > { %1113 = vst [vmem:[%s1837_s8 + $0x28] sm:$0xff] %v1081_v3  ;;  %1129 = vst [vmem:[%s1837_s8 + $0xa8] sm:$0xff] %v1097_v37  ;;  %v1083_v43 = vadd.f32 %v1051_v38, %v558_v35  ;;  %v1099_v44 = vadd.f32 %v1067_v39, %v574_v36  ;;  %v905_v45 = vpop.f32.mrb[8].mxu0  ;;  %v945_v46 = vpop.f32.mrb[8].mxu1  ;;  %v579_v35 = vld [vmem:[%s1837_s8 + $0xe0] sm:$0xff] }
 0x178   : > { %1114 = vst [vmem:[%s1837_s8 + $0x30] sm:$0xff] %v1082_v41  ;;  %1130 = vst [vmem:[%s1837_s8 + $0xb0] sm:$0xff] %v1098_v42  ;;  %v906_v6 = vadd.f32 %v905_v45, %v1947_v14  ;;  %v946_v47 = vadd.f32 %v945_v46, %v1947_v14  ;;  %v907_v48 = vpop.f32.mrb[9].mxu0  ;;  %v947_v49 = vpop.f32.mrb[9].mxu1  ;;  %v564_v41 = vld [vmem:[%s1837_s8 + $0x68] sm:$0xff] }
 0x179   : > { %1115 = vst [vmem:[%s1837_s8 + $0x38] sm:$0xff] %v1083_v43  ;;  %1131 = vst [vmem:[%s1837_s8 + $0xb8] sm:$0xff] %v1099_v44  ;;  %v908_v52 = vadd.f32 %v907_v48, %v1951_v16  ;;  %v948_v53 = vadd.f32 %v947_v49, %v1951_v16  ;;  %v909_v54 = vpop.f32.mrb[10].mxu0  ;;  %v949_v55 = vpop.f32.mrb[10].mxu1  ;;  %v580_v42 = vld [vmem:[%s1837_s8 + $0xe8] sm:$0xff]  ;;  %v565_v49 = vld [vmem:[%s1837_s8 + $0x70] sm:$0xff] }
 0x17a   : > { %v1052_v56 = vmul.f32 %v1940_v7, %v906_v6  ;;  %v1068_v57 = vmul.f32 %v1027_v40, %v946_v47  ;;  %v910_v60 = vadd.f32 %v909_v54, %v1947_v14  ;;  %v950_v61 = vadd.f32 %v949_v55, %v1947_v14  ;;  %v911_v62 = vpop.f32.mrb[11].mxu0  ;;  %v951_v63 = vpop.f32.mrb[11].mxu1 }
 0x17b   : > { %v1053_v1 = vmul.f32 %v1940_v7, %v908_v52  ;;  %v1069_v2 = vmul.f32 %v1027_v40, %v948_v53  ;;  %v912_v8 = vadd.f32 %v911_v62, %v1951_v16  ;;  %v952_v11 = vadd.f32 %v951_v63, %v1951_v16  ;;  %v1042_v6 = vpop.permute.xlu1 %1041 }
 0x17c   : > { %v1084_v12 = vadd.f32 %v1052_v56, %v559_v50  ;;  %v1100_v13 = vadd.f32 %v1068_v57, %v575_v51  ;;  %v1054_v17 = vmul.f32 %v1942_v9, %v910_v60  ;;  %v1070_v18 = vmul.f32 %v1032_v0, %v950_v61  ;;  %v581_v50 = vld [vmem:[%s1837_s8 + $0xf0] sm:$0xff]  ;;  %v566_v56 = vld [vmem:[%s1837_s8 + $0x78] sm:$0xff] }
 0x17d   : > { %v1085_v7 = vadd.f32 %v1053_v1, %v560_v58  ;;  %v1101_v21 = vadd.f32 %v1069_v2, %v576_v59  ;;  %v1055_v22 = vmul.f32 %v1942_v9, %v912_v8  ;;  %v1071_v23 = vmul.f32 %v1032_v0, %v952_v11 }
 0x17e   : > { %1116 = vst [vmem:[%s1837_s8 + $0x40] sm:$0xff] %v1084_v12  ;;  %1132 = vst [vmem:[%s1837_s8 + $0xc0] sm:$0xff] %v1100_v13  ;;  %v1086_v25 = vadd.f32 %v1054_v17, %v561_v4  ;;  %v1102_v26 = vadd.f32 %v1070_v18, %v577_v5 }
 0x17f   : > { %1117 = vst [vmem:[%s1837_s8 + $0x48] sm:$0xff] %v1085_v7  ;;  %1133 = vst [vmem:[%s1837_s8 + $0xc8] sm:$0xff] %v1101_v21  ;;  %v1087_v27 = vadd.f32 %v1055_v22, %v562_v19  ;;  %v1103_v28 = vadd.f32 %v1071_v23, %v578_v20  ;;  %v915_v29 = vpop.f32.mrb[12].mxu0  ;;  %v955_v30 = vpop.f32.mrb[12].mxu1 }
 0x180   : > { %1118 = vst [vmem:[%s1837_s8 + $0x50] sm:$0xff] %v1086_v25  ;;  %1134 = vst [vmem:[%s1837_s8 + $0xd0] sm:$0xff] %v1102_v26  ;;  %v916_v9 = vadd.f32 %v915_v29, %v1947_v14  ;;  %v956_v31 = vadd.f32 %v955_v30, %v1947_v14  ;;  %v917_v32 = vpop.f32.mrb[13].mxu0  ;;  %v957_v33 = vpop.f32.mrb[13].mxu1 }
 0x181   : > { %1119 = vst [vmem:[%s1837_s8 + $0x58] sm:$0xff] %v1087_v27  ;;  %1135 = vst [vmem:[%s1837_s8 + $0xd8] sm:$0xff] %v1103_v28  ;;  %v918_v36 = vadd.f32 %v917_v32, %v1951_v16  ;;  %v958_v3 = vadd.f32 %v957_v33, %v1951_v16  ;;  %v919_v37 = vpop.f32.mrb[14].mxu0  ;;  %v959_v38 = vpop.f32.mrb[14].mxu1 }
 0x182   : > { %v1056_v39 = vmul.f32 %v1944_v10, %v916_v9  ;;  %v1072_v40 = vmul.f32 %v1037_v24, %v956_v31  ;;  %v920_v43 = vadd.f32 %v919_v37, %v1947_v14  ;;  %v960_v44 = vadd.f32 %v959_v38, %v1947_v14  ;;  %v921_v45 = vpop.f32.mrb[15].mxu0  ;;  %v961_v46 = vpop.f32.mrb[15].mxu1 }
 0x183   : > { %v1057_v47 = vmul.f32 %v1944_v10, %v918_v36  ;;  %v1073_v48 = vmul.f32 %v1037_v24, %v958_v3  ;;  %v922_v51 = vadd.f32 %v921_v45, %v1951_v16  ;;  %v962_v52 = vadd.f32 %v961_v46, %v1951_v16  ;;  %v582_v10 = vld [vmem:[%s1837_s8 + $0xf8] sm:$0xff] }
 0x184   : > { %v1088_v53 = vadd.f32 %v1056_v39, %v563_v34  ;;  %v1104_v54 = vadd.f32 %v1072_v40, %v579_v35  ;;  %v1058_v14 = vmul.f32 %v1949_v15, %v920_v43  ;;  %v1074_v55 = vmul.f32 %v1042_v6, %v960_v44 }
 0x185   : > { %v1089_v57 = vadd.f32 %v1057_v47, %v564_v41  ;;  %v1105_v58 = vadd.f32 %v1073_v48, %v580_v42  ;;  %v1059_v59 = vmul.f32 %v1949_v15, %v922_v51  ;;  %v1075_v60 = vmul.f32 %v1042_v6, %v962_v52 }
 0x186   : > { %1120 = vst [vmem:[%s1837_s8 + $0x60] sm:$0xff] %v1088_v53  ;;  %1136 = vst [vmem:[%s1837_s8 + $0xe0] sm:$0xff] %v1104_v54  ;;  %v1090_v16 = vadd.f32 %v1058_v14, %v565_v49  ;;  %v1106_v61 = vadd.f32 %v1074_v55, %v581_v50 }
 0x187   : > { %1121 = vst [vmem:[%s1837_s8 + $0x68] sm:$0xff] %v1089_v57  ;;  %1137 = vst [vmem:[%s1837_s8 + $0xe8] sm:$0xff] %v1105_v58  ;;  %v1091_v62 = vadd.f32 %v1059_v59, %v566_v56  ;;  %v1107_v63 = vadd.f32 %v1075_v60, %v582_v10 }
 0x188   : > { %1122 = vst [vmem:[%s1837_s8 + $0x70] sm:$0xff] %v1090_v16  ;;  %1138 = vst [vmem:[%s1837_s8 + $0xf0] sm:$0xff] %v1106_v61 }
 0x189   : > { %1123 = vst [vmem:[%s1837_s8 + $0x78] sm:$0xff] %v1091_v62  ;;  %1139 = vst [vmem:[%s1837_s8 + $0xf8] sm:$0xff] %v1107_v63 }
 0x18a PF: > { %s1381_s10 = sshll.u32 %s1673_s9, 12  ;;  %s1157_s21 = sshll.u32 %s1837_s8, 4  ;;  %s2068_s21 = int_to_ptr.vmem [resolvable:$true] %s1157_s21 }
 0x18b   : > { %s2065_s16 = scalar_lea.hbm %s2129_s6, %s1381_s10  ;;  %s2144_s22 = sand.u32 1, %s1661_s30  }
 0x18c   : > { %s2072_s23 = scalar_lea.sflag [#allocation7], %s2144_s22  ;;  %s1589_s24 = scalar_lea.vmem %s2068_s21, 4096 }
 0x18d   : > { %p1590_p0 = scmp.ne.s32.totalorder %s2068_s21, %s1589_s24  ;;  %s1691_s9 = smov [#allocation6]  }
 0x18e   : > { %s1593_s14 = sshll.u32 %s1691_s9, 4  ;;  %s1594_s14 = int_to_ptr.vmem [resolvable:$false] %s1593_s14 }
 0x18f   : > { %p1591_p1 = pnand %p1590_p0, %p1784_p13  ;;  %s1595_s19 = scalar_lea.vmem %s1594_s14, 8192 }
 0x190   : > { %p1596_p3 = scmp.lt.s32.totalorder %s2068_s21, %s1594_s14  ;;  %p1597_p4 = scmp.lt.s32.totalorder %s1595_s19, %s1589_s24 }
 0x191   : > { %p1592_p2 = pneg %p1591_p1 }
 0x192   : > { %p1598_p6 = por %p1597_p4, %p1596_p3 }
 0x194   : > { %p1599_p7 = pnand %p1598_p6, %p1592_p2 }
 0x196   : > { %1602 = shalt.err (!%p1599_p7)
}
 0x197   : > { %s1603_s20 = scalar_lea.hbm %s2065_s16, 4096  ;;  %s1607_s0 = scalar_lea.hbm %s2129_s6, 8192 }
 0x198   : > { %p1604_p8 = scmp.ne.s32.totalorder %s2065_s16, %s1603_s20  ;;  %p1608_p11 = scmp.lt.u32.totalorder %s2065_s16, %s2129_s6 }
 0x199   : > { %p1609_p12 = scmp.lt.u32.totalorder %s1607_s0, %s1603_s20  ;;  %p1611_p1 = scmp.lt.u32.totalorder %s1603_s20, %s2065_s16 }
 0x19a   : > { %p1605_p9 = pnand %p1604_p8, %p1784_p13 }
 0x19b   : > { %p1610_p0 = por %p1609_p12, %p1608_p11 }
 0x19c   : > { %p1606_p10 = pneg %p1605_p9 }
 0x19d   : > { %p1612_p2 = por %p1611_p1, %p1610_p0 }
 0x19f   : > { %p1613_p3 = pnand %p1612_p2, %p1606_p10 }
 0x1a1   : > { %1616 = shalt.err (!%p1613_p3)
}
 0x1a2   : > { %s1692_s29 = smov 256   ;;  %s1693_s13 = smov 16  }
 0x1a3   : > { %1414 = dma.vmem_to_hbm [thread:$0]  (%p1784_p13), %s2068_s21, 4096, %s2065_s16, %s2072_s23, %s1692_s29, %s1692_s29, %s1693_s13  }
 0x1a4 PF: > { %p1420_p4 = scmp.ge.s32.totalorder %s1685_s12, 2  ;;  %s1172_s8 = sand.u32 1, %s1657_s1  }
 0x1a5   : > { %s1173_s2 = scalar_lea.sflag [#allocation7], %s1172_s8 }
 0x1a6   : > { %p1417_p6 = pnand %p1420_p4, %p1794_p5 }
 0x1a8   : > { %1652 = dma.done.wait (!%p1417_p6), %s1173_s2, 4096  }
 0x1a9   : > { %1654 = vsyncadd (!%p1417_p6), %s1173_s2, 4294963200  ;;  %s29_s12 = sadd.s32 1, %s1685_s12   ;;  %s2145_s10 = sld [smem:[#allocation14_spill]] }
 0x1aa   : > { %p26_p7 = scmp.ge.s32.totalorder %s29_s12, 18   ;;  %s2146_s8 = sld [smem:[#allocation10_spill]] }
 0x1ab   : > { %s2147_s9 = sld [smem:[#allocation11_spill]]  ;;  %s2148_s17 = sld [smem:[#allocation12_spill]] }
 0x1ac   : > { %s2149_s11 = sld [smem:[#allocation13_spill]]  ;;  %s2150_s1 = smov %s1661_s30 }
 0x1ad   : > { %s2151_s30 = smov %s1665_s7  ;;  %28 = sbr.rel (!%p26_p7) target bundleno = 31 (0x1f), region = 88 }
 0x1af   : > { %s2152_s7 = smov %s2145_s10 }
 0x1b1   : > { %s2153_s10 = smov %s2148_s17 }
 0x1b4   :  { %1178 = vsyncpa [#allocation7], 1 }
 0x1b5   :  { %1180 = vsyncpa [#allocation7 + $0x1], 1 }

</bundles_post_ra>
